<compile_context>
chip_gen: v7x
topology: tpu7x:2x2x1
jax: 0.10.0
libtpu: 0.0.40
codegen_flags: <defaults>
</compile_context>

<pallas_src>
import jax
import jax.numpy as jnp
import numpy as np
from jax.experimental import pallas as pl
from jax.experimental.pallas import tpu as pltpu


def _copy_kernel(x_ref, o_ref):
    # Pure streaming copy of the current lane-dense tile.
    o_ref[...] = x_ref[...]


# Per-buffer VMEM budget.  4 resident (double-buffered in+out) copies of a
# 2 MiB block = 8 MiB, safely below the default scoped-VMEM limit on
# v5e (16 MiB), v6e (32 MiB) and v7x (32 MiB scoped / 64 MiB physical).
_TARGET_BLOCK_BYTES = 2 * 1024 * 1024


def _pick_tiling(total_elems: int, itemsize: int):
    """Choose a lane-dense (rows, lane) view and a row-tile size.

    Returns (rows, lane, block_rows) or None if no lane width >= 128 divides
    the element count (tiny / odd-sized tensors fall back to a single block).
    """
    for lane in (1024, 512, 256, 128):
        if total_elems % lane == 0:
            rows = total_elems // lane
            # Rows per block: multiple of 8, targeting ~_TARGET_BLOCK_BYTES.
            target_rows = max(8, _TARGET_BLOCK_BYTES // (lane * itemsize))
            target_rows = (target_rows // 8) * 8
            if rows <= target_rows:
                block_rows = rows      # full extent -> always layout-legal
            else:
                block_rows = target_rows  # multiple of 8; ragged last block is masked
            return rows, lane, block_rows
    return None


def do_nothing(x: jnp.ndarray) -> jnp.ndarray:
    """Pallas identity (Layer's DoNothing): returns a tensor equal to x.

    With input_output_aliases the output shares the input buffer; under a
    donating jit the whole kernel becomes (near) zero-cost.
    """
    orig_shape = x.shape
    total = int(np.prod(orig_shape)) if len(orig_shape) > 0 else 1
    itemsize = jnp.dtype(x.dtype).itemsize

    tiling = _pick_tiling(total, itemsize)

    if tiling is None:
        # Fallback for element counts not divisible by 128: one block equal to
        # the full (necessarily small) flat array, which satisfies layout rules.
        flat = x.reshape(1, total)
        spec = pl.BlockSpec((1, total), lambda i: (i, 0))
        y = pl.pallas_call(
            _copy_kernel,
            out_shape=jax.ShapeDtypeStruct(flat.shape, flat.dtype),
            grid_spec=pltpu.PrefetchScalarGridSpec(
                num_scalar_prefetch=0,
                grid=(1,),
                in_specs=[spec],
                out_specs=spec,
            ),
            input_output_aliases={0: 0},
        )(flat)
        return y.reshape(orig_shape)

    rows, lane, block_rows = tiling
    flat = x.reshape(rows, lane)           # bitcast-free, lane-dense 2D view
    grid = (pl.cdiv(rows, block_rows),)
    spec = pl.BlockSpec((block_rows, lane), lambda i: (i, 0))

    y = pl.pallas_call(
        _copy_kernel,
        out_shape=jax.ShapeDtypeStruct((rows, lane), x.dtype),
        grid_spec=pltpu.PrefetchScalarGridSpec(
            num_scalar_prefetch=0,
            grid=grid,
            in_specs=[spec],
            out_specs=spec,
        ),
        input_output_aliases={0: 0},
        compiler_params=pltpu.CompilerParams(
            dimension_semantics=("parallel",),  # shards row-tiles across TCs on v7x
        ),
    )(flat)
    return y.reshape(orig_shape)


if __name__ == "__main__":
    key = jax.random.PRNGKey(0)

    # Primary test: the module's NCHW-style input.
    x = jax.random.normal(key, (2, 4, 16, 16), dtype=jnp.float32)
    y = do_nothing(x)
    jax.block_until_ready(y)
    assert y.shape == x.shape
    assert y.dtype == x.dtype
    assert bool(jnp.all(y == x))

    # Secondary sanity check: a shape large enough to exercise the multi-tile
    # (grid > 1) lane-dense path.
    x2 = jax.random.normal(jax.random.PRNGKey(1), (16, 8, 64, 128), dtype=jnp.float32)
    y2 = do_nothing(x2)
    jax.block_until_ready(y2)
    assert y2.shape == x2.shape and y2.dtype == x2.dtype
    assert bool(jnp.all(y2 == x2))

    print("KERNEL_OK")
</pallas_src>

<mosaic_0001>
module attributes {stable_mosaic.version = 11 : i64} {
  func.func @_copy_kernel(%arg0: i32, %arg1: memref<2x1024xf32, #tpu.memory_space<vmem>>, %arg2: memref<2x1024xf32, #tpu.memory_space<vmem>>) attributes {dimension_semantics = [#tpu.dimension_semantics<parallel>], iteration_bounds = array<i64: 1>, scalar_prefetch = 0 : i64, scratch_operands = 0 : i64, tpu.core_type = #tpu.core_type<tc>, window_params = [{transform_indices = @transform_0, window_bounds = array<i64: 2, 1024>}, {transform_indices = @transform_1, window_bounds = array<i64: 2, 1024>}]} {
    %c0 = arith.constant 0 : index
    %c0_0 = arith.constant 0 : index
    %0 = vector.load %arg1[%c0, %c0_0] : memref<2x1024xf32, #tpu.memory_space<vmem>>, vector<2x1024xf32>
    %c0_1 = arith.constant 0 : index
    %c0_2 = arith.constant 0 : index
    %1 = vector.load %arg2[%c0_1, %c0_2] : memref<2x1024xf32, #tpu.memory_space<vmem>>, vector<2x1024xf32>
    tpu.vector_store %arg2[%c0_1, %c0_2], %0 {strides = array<i32>} : memref<2x1024xf32, #tpu.memory_space<vmem>>, vector<2x1024xf32>,
    return
  }
  func.func @transform_0(%arg0: i32) -> (i32, i32) {
    %c0_i32 = arith.constant 0 : i32
    %c0_i32_0 = arith.constant 0 : i32
    return %arg0, %c0_i32 : i32, i32
  }
  func.func @transform_1(%arg0: i32) -> (i32, i32) {
    %c0_i32 = arith.constant 0 : i32
    %c0_i32_0 = arith.constant 0 : i32
    return %arg0, %c0_i32 : i32, i32
  }
}

</mosaic_0001>

<bundles_post_ra>
// kernel: tpu_custom_call.1
= control target key start
LH: loop header
LB: loop body
LE: loop exit
PB: predicated region body
PF: predicated region fallthrough
CT: control target
= control target key end

     0   :  { %6 = vsyncpa [#allocation3], 0  ;;  %s126_s0 = inlined_call_operand.hbm [shape: f32[2,1024], index: 0, kind: input, shape index: {}, may-alias: {0,1}]   ;;  %s127_s1 = inlined_call_operand.hbm [shape: f32[2,1024], index: 1, kind: output, shape index: {}, may-alias: {0,1}]  }
   0x1   :  { %7 = vsyncpa [#allocation4], 0  ;;  %s90_s6 = smov [#allocation2]   ;;  %s42_s10 = scalar_lea.hbm %s126_s0, 256 }
   0x2   :  { %s14_s7 = sshll.u32 %s90_s6, 4  ;;  %p43_p0 = scmp.ne.s32.totalorder %s126_s0, %s42_s10  ;;  %s15_s7 = int_to_ptr.vmem [resolvable:$true] %s14_s7 }
   0x3   :  { %p46_p1 = scmp.lt.u32.totalorder %s42_s10, %s126_s0 }
   0x5   :  { %p48_p2 = pnand %p46_p1, %p43_p0 }
   0x7   :  { %51 = shalt.err (!%p48_p2)
}
   0x8   :  { %s52_s15 = scalar_lea.vmem %s15_s7, 256  ;;  %p57_p4 = scmp.lt.s32.totalorder %s15_s7, %s15_s7 }
   0x9   :  { %p53_p3 = scmp.ne.s32.totalorder %s15_s7, %s52_s15  ;;  %p58_p5 = scmp.lt.s32.totalorder %s52_s15, %s52_s15 }
   0xb   :  { %p59_p6 = por %p58_p5, %p57_p4 }
   0xd   :  { %p60_p7 = pnand %p59_p6, %p53_p3 }
   0xf   :  { %63 = shalt.err (!%p60_p7)
}
  0x10   :  { %17 = dma.hbm_to_vmem [thread:$0]  %s126_s0, 256, %s15_s7, [#allocation3]  }
  0x11   :  { %86 = dma.done.wait [#allocation3], 256  }
  0x12   :  { %87 = vsyncadd [#allocation3], 4294967040  ;;  %s91_s18 = smov [#allocation5]   ;;  %v21_v0 = vld [vmem:[#allocation2] sm:$0xff]  ;;  %v22_v1 = vld [vmem:[#allocation2 + $0x8] sm:$0xff] }
  0x13   :  { %s31_s19 = sshll.u32 %s91_s18, 4  ;;  %23 = vst [vmem:[#allocation5] sm:$0xff] %v21_v0  ;;  %24 = vst [vmem:[#allocation5 + $0x8] sm:$0xff] %v22_v1  ;;  %s32_s19 = int_to_ptr.vmem [resolvable:$true] %s31_s19 }
  0x14   :  { %s64_s20 = scalar_lea.vmem %s32_s19, 256  ;;  %p69_p9 = scmp.lt.s32.totalorder %s32_s19, %s32_s19 }
  0x15   :  { %p65_p8 = scmp.ne.s32.totalorder %s32_s19, %s64_s20  ;;  %p70_p10 = scmp.lt.s32.totalorder %s64_s20, %s64_s20 }
  0x17   :  { %p71_p11 = por %p70_p10, %p69_p9 }
  0x19   :  { %p72_p12 = pnand %p71_p11, %p65_p8 }
  0x1b   :  { %75 = shalt.err (!%p72_p12)
}
  0x1c   :  { %s76_s0 = scalar_lea.hbm %s127_s1, 256 }
  0x1d   :  { %p77_p13 = scmp.ne.s32.totalorder %s127_s1, %s76_s0  ;;  %p80_p0 = scmp.lt.u32.totalorder %s76_s0, %s127_s1 }
  0x1f   :  { %p82_p1 = pnand %p80_p0, %p77_p13 }
  0x21   :  { %85 = shalt.err (!%p82_p1)
}
  0x22   :  { %34 = dma.vmem_to_hbm [thread:$0]  %s32_s19, 256, %s127_s1, [#allocation4]  }
  0x23   :  { %88 = dma.done.wait [#allocation4], 256  }
  0x24   :  { %89 = vsyncadd [#allocation4], 4294967040 }
  0x25   :  { %38 = vsyncpa [#allocation3], 1 }
  0x26   :  { %39 = vsyncpa [#allocation4], 1 }

</bundles_post_ra>
